<compile_context>
chip_gen: v6e
topology: v6e:2x2x1
jax: 0.10.0
libtpu: 0.0.40
codegen_flags: <defaults>
</compile_context>

<pallas_src>
import functools

import jax
import jax.numpy as jnp
import numpy as np
from jax import lax
from jax.experimental import pallas as pl
from jax.experimental.pallas import tpu as pltpu


# ----------------------------------------------------------------------------
# Adaptive average pooling as a matrix (PyTorch AdaptiveAvgPool2d semantics).
# ----------------------------------------------------------------------------
def _adaptive_pool_1d(in_size: int, out_size: int) -> np.ndarray:
    """Row-stochastic (out_size, in_size) matrix implementing 1-D adaptive avg pool."""
    m = np.zeros((out_size, in_size), dtype=np.float32)
    for o in range(out_size):
        start = (o * in_size) // out_size                   # floor(o * I / O)
        end = -(-((o + 1) * in_size) // out_size)           # ceil((o+1) * I / O)
        m[o, start:end] = 1.0 / (end - start)
    return m


def _adaptive_pool_matrix(hf: int, wf: int, out_hw) -> np.ndarray:
    """(L=OH*OW, P=Hf*Wf) matrix K with K[lh*OW+lw, h*Wf+w] = Ph[lh,h]*Pw[lw,w]."""
    oh, ow = out_hw
    ph = _adaptive_pool_1d(hf, oh)                          # (OH, Hf)
    pw = _adaptive_pool_1d(wf, ow)                          # (OW, Wf)
    return np.einsum("ah,bw->abhw", ph, pw).reshape(oh * ow, hf * wf)


# ----------------------------------------------------------------------------
# Kernels: one batch block (tb images) per grid program.
#   x_ref  : (tb, C, P)  channel-major feature block (P = Hf*Wf) — no transpose needed
#   k_ref  : (L, P)      adaptive-avg-pool matrix (rows sum to 1)     [pool path only]
#   w_ref  : (C, D)      1x1 conv weight, stored (in, out)  (PyTorch weight[:, :, 0, 0].T)
#   b_ref  : (1, D)      1x1 conv bias (f32)
#   out_ref: (tb, L, D)  annotation vectors (lane-dense, channel-last)
# ----------------------------------------------------------------------------
def _pool_conv_kernel(x_ref, k_ref, w_ref, b_ref, out_ref, *, tb: int):
    w = w_ref[...]                                              # (C, D), hoisted
    k = k_ref[...]                                              # (L, P), hoisted
    bias = jnp.broadcast_to(b_ref[...], out_ref.shape[1:])      # (L, D) f32, hoisted once
    for b in range(tb):                                         # static unroll, tb small
        x_b = x_ref[b]                                          # (C, P) ref-level index
        # pool: (L, P) x (C, P) contracting P  ->  (L, C)   (spatial reduction on MXU)
        pooled_t = lax.dot_general(
            k, x_b, (((1,), (1,)), ((), ())),
            preferred_element_type=jnp.float32)                 # (L, C)
        # 1x1 conv: canonical (L, C) @ (C, D) MXU matmul
        res = jnp.dot(pooled_t.astype(x_b.dtype), w,
                      preferred_element_type=jnp.float32)       # (L, D)
        out_ref[b] = (res + bias).astype(out_ref.dtype)


def _conv_only_kernel(x_ref, w_ref, b_ref, out_ref, *, tb: int):
    # Fast path: (Hf, Wf) == out_hw -> adaptive pool is the identity.
    w = w_ref[...]                                              # (C, D)
    bias = jnp.broadcast_to(b_ref[...], out_ref.shape[1:])      # (L, D) f32, hoisted
    for b in range(tb):
        # (C, L) x (C, D) contracting C (transposed-LHS MXU matmul) -> (L, D)
        res = lax.dot_general(
            x_ref[b], w, (((0,), (0,)), ((), ())),
            preferred_element_type=jnp.float32)
        out_ref[b] = (res + bias).astype(out_ref.dtype)


# ----------------------------------------------------------------------------
# Wrapper
# ----------------------------------------------------------------------------
def encoder_cnn_head(feats_nchw, w_proj, b_proj, out_hw=(14, 14), tb=None,
                     compute_dtype=jnp.bfloat16, out_dtype=jnp.float32):
    """feats_nchw: (B, C, Hf, Wf) backbone features -> (B, L=OH*OW, D).

    w_proj is (C_in, D_out) so y = x @ W  (i.e. PyTorch Conv2d weight[:, :, 0, 0].T).
    """
    B, C, Hf, Wf = feats_nchw.shape
    assert w_proj.shape[0] == C, "w_proj must be (in_channels, out_channels)"
    D = w_proj.shape[1]
    oh, ow = out_hw
    L = oh * ow
    P = Hf * Wf

    if tb is None:
        cap = min(8, max(1, B // 2))                        # grid >= 2 when B >= 2
        tb = max(d for d in range(1, cap + 1) if B % d == 0)
    assert B % tb == 0, "batch must be divisible by the batch block tb"

    # (B, C, Hf, Wf) -> (B, C, P): pure reshape, no HBM transpose.
    x = feats_nchw.reshape(B, C, P).astype(compute_dtype)
    w = w_proj.astype(compute_dtype)
    bias2d = b_proj.reshape(1, D).astype(jnp.float32)

    use_pool = (Hf, Wf) != (oh, ow)

    in_specs = [pl.BlockSpec((tb, C, P), lambda i: (i, 0, 0))]     # blocked on batch
    args = [x]
    if use_pool:
        k_mat = jnp.asarray(_adaptive_pool_matrix(Hf, Wf, out_hw), compute_dtype)
        in_specs.append(pl.BlockSpec((L, P), lambda i: (0, 0)))    # VMEM-resident
        args.append(k_mat)
        kernel = functools.partial(_pool_conv_kernel, tb=tb)
    else:
        kernel = functools.partial(_conv_only_kernel, tb=tb)
    in_specs += [
        pl.BlockSpec((C, D), lambda i: (0, 0)),                    # conv weight (resident)
        pl.BlockSpec((1, D), lambda i: (0, 0)),                    # conv bias   (resident)
    ]
    args += [w, bias2d]

    grid_spec = pltpu.PrefetchScalarGridSpec(
        num_scalar_prefetch=0,
        grid=(B // tb,),
        in_specs=in_specs,
        out_specs=pl.BlockSpec((tb, L, D), lambda i: (i, 0, 0)),   # lane-dense output
    )

    return pl.pallas_call(
        kernel,
        out_shape=jax.ShapeDtypeStruct((B, L, D), out_dtype),
        grid_spec=grid_spec,
        compiler_params=pltpu.CompilerParams(
            dimension_semantics=("parallel",),                     # independent batch blocks
            vmem_limit_bytes=48 * 1024 * 1024,                     # safe on v7x's 64 MiB
        ),
    )(*args)


# ----------------------------------------------------------------------------
# Pure-JAX reference mirroring the PyTorch forward (pool -> 1x1 conv -> permute)
# ----------------------------------------------------------------------------
def reference(feats_nchw, w_proj, b_proj, out_hw=(14, 14)):
    B, C, Hf, Wf = feats_nchw.shape
    D = w_proj.shape[1]
    oh, ow = out_hw
    ph = jnp.asarray(_adaptive_pool_1d(Hf, oh))             # (OH, Hf)
    pw = jnp.asarray(_adaptive_pool_1d(Wf, ow))             # (OW, Wf)
    pooled = jnp.einsum("oh,bchw,pw->bcop", ph, feats_nchw, pw)        # (B, C, OH, OW)
    proj = jnp.einsum("bcop,cd->bdop", pooled, w_proj) + b_proj[None, :, None, None]
    return proj.reshape(B, D, oh * ow).transpose(0, 2, 1)   # (B, L, D)


if __name__ == "__main__":
    key = jax.random.PRNGKey(0)
    k1, k2, k3 = jax.random.split(key, 3)

    # Small stand-in for the backbone output (VGG19 would be (B, 512, Hf, Wf)).
    B, C, Hf, Wf = 4, 32, 16, 16
    D = C                                                   # project: Conv2d(feat_dim, feat_dim, 1)
    feats = jax.random.normal(k1, (B, C, Hf, Wf), jnp.float32)
    w_proj = jax.random.normal(k2, (C, D), jnp.float32) * 0.1   # stored (in, out): y = x @ W
    b_proj = jax.random.normal(k3, (D,), jnp.float32) * 0.1

    # --- Case 1: pooled path (16x16 -> 14x14), bf16 MXU inputs (production default).
    out = jax.block_until_ready(encoder_cnn_head(feats, w_proj, b_proj))
    ref = reference(feats, w_proj, b_proj)
    assert out.shape == (B, 14 * 14, D), out.shape
    err = float(jnp.max(jnp.abs(out - ref)))
    scale = float(jnp.max(jnp.abs(ref)))
    assert err <= 0.05 * scale + 1e-2, f"bf16 pool-path mismatch: max_err={err}, scale={scale}"

    # --- Case 2: identity-pool fast path (14x14 input), f32 for an exact check.
    feats14 = jax.random.normal(k1, (B, C, 14, 14), jnp.float32)
    out14 = jax.block_until_ready(
        encoder_cnn_head(feats14, w_proj, b_proj, compute_dtype=jnp.float32))
    ref14 = reference(feats14, w_proj, b_proj)
    err14 = float(jnp.max(jnp.abs(out14 - ref14)))
    assert out14.shape == (B, 14 * 14, D), out14.shape
    assert err14 <= 1e-4, f"f32 identity-path mismatch: max_err={err14}"

    print("KERNEL_OK")
</pallas_src>

<mosaic_0001>
module attributes {stable_mosaic.version = 11 : i64} {
  func.func @_pool_conv_kernel(%arg0: i32, %arg1: memref<2x32x256xbf16, #tpu.memory_space<vmem>>, %arg2: memref<196x256xbf16, #tpu.memory_space<vmem>>, %arg3: memref<32x32xbf16, #tpu.memory_space<vmem>>, %arg4: memref<1x32xf32, #tpu.memory_space<vmem>>, %arg5: memref<2x196x32xf32, #tpu.memory_space<vmem>>) attributes {dimension_semantics = [#tpu.dimension_semantics<parallel>], iteration_bounds = array<i64: 2>, scalar_prefetch = 0 : i64, scratch_operands = 0 : i64, tpu.core_type = #tpu.core_type<tc>, window_params = [{transform_indices = @transform_0, window_bounds = array<i64: 2, 32, 256>}, {pipeline_mode = #tpu.pipeline_mode<synchronous>, transform_indices = @transform_1, window_bounds = array<i64: 196, 256>}, {pipeline_mode = #tpu.pipeline_mode<synchronous>, transform_indices = @transform_2, window_bounds = array<i64: 32, 32>}, {pipeline_mode = #tpu.pipeline_mode<synchronous>, transform_indices = @transform_3, window_bounds = array<i64: 1, 32>}, {transform_indices = @transform_4, window_bounds = array<i64: 2, 196, 32>}]} {
    %c0 = arith.constant 0 : index
    %c0_0 = arith.constant 0 : index
    %0 = vector.load %arg3[%c0, %c0_0] : memref<32x32xbf16, #tpu.memory_space<vmem>>, vector<32x32xbf16>
    %c0_1 = arith.constant 0 : index
    %c0_2 = arith.constant 0 : index
    %1 = vector.load %arg2[%c0_1, %c0_2] : memref<196x256xbf16, #tpu.memory_space<vmem>>, vector<196x256xbf16>
    %c0_3 = arith.constant 0 : index
    %c0_4 = arith.constant 0 : index
    %2 = vector.load %arg4[%c0_3, %c0_4] : memref<1x32xf32, #tpu.memory_space<vmem>>, vector<1x32xf32>
    %3 = vector.shape_cast %2 : vector<1x32xf32> to vector<1x32xf32>
    %4 = vector.broadcast %3 : vector<1x32xf32> to vector<196x32xf32>
    %c0_5 = arith.constant 0 : index
    %c0_6 = arith.constant 0 : index
    %c0_7 = arith.constant 0 : index
    %5 = vector.load %arg1[%c0_5, %c0_6, %c0_7] : memref<2x32x256xbf16, #tpu.memory_space<vmem>>, vector<1x32x256xbf16>
    %6 = vector.shape_cast %5 : vector<1x32x256xbf16> to vector<32x256xbf16>
    %cst = arith.constant dense<0.000000e+00> : vector<196x32xf32>
    %7 = tpu.matmul %1, %6, %cst {dimension_numbers = #tpu.dot_dimension_numbers<[1], [1], [0], [0], [0, 0, 1, 0], [], []>} : vector<196x256xbf16>, vector<32x256xbf16>, vector<196x32xf32> -> vector<196x32xf32>
    %8 = arith.truncf %7 : vector<196x32xf32> to vector<196x32xbf16>
    %cst_8 = arith.constant dense<0.000000e+00> : vector<196x32xf32>
    %9 = tpu.matmul %8, %0, %cst_8 {dimension_numbers = #tpu.dot_dimension_numbers<[1], [0], [0], [1], [0, 0, 1, 1], [], []>} : vector<196x32xbf16>, vector<32x32xbf16>, vector<196x32xf32> -> vector<196x32xf32>
    %10 = arith.addf %9, %4 : vector<196x32xf32>
    %c0_9 = arith.constant 0 : index
    %c0_10 = arith.constant 0 : index
    %c0_11 = arith.constant 0 : index
    %11 = vector.load %arg5[%c0_9, %c0_10, %c0_11] : memref<2x196x32xf32, #tpu.memory_space<vmem>>, vector<1x196x32xf32>
    %12 = vector.shape_cast %11 : vector<1x196x32xf32> to vector<196x32xf32>
    %13 = vector.shape_cast %10 : vector<196x32xf32> to vector<1x196x32xf32>
    tpu.vector_store %arg5[%c0_9, %c0_10, %c0_11], %13 {strides = array<i32>} : memref<2x196x32xf32, #tpu.memory_space<vmem>>, vector<1x196x32xf32>,
    %c1 = arith.constant 1 : index
    %c0_12 = arith.constant 0 : index
    %c0_13 = arith.constant 0 : index
    %14 = vector.load %arg1[%c1, %c0_12, %c0_13] : memref<2x32x256xbf16, #tpu.memory_space<vmem>>, vector<1x32x256xbf16>
    %15 = vector.shape_cast %14 : vector<1x32x256xbf16> to vector<32x256xbf16>
    %cst_14 = arith.constant dense<0.000000e+00> : vector<196x32xf32>
    %16 = tpu.matmul %1, %15, %cst_14 {dimension_numbers = #tpu.dot_dimension_numbers<[1], [1], [0], [0], [0, 0, 1, 0], [], []>} : vector<196x256xbf16>, vector<32x256xbf16>, vector<196x32xf32> -> vector<196x32xf32>
    %17 = arith.truncf %16 : vector<196x32xf32> to vector<196x32xbf16>
    %cst_15 = arith.constant dense<0.000000e+00> : vector<196x32xf32>
    %18 = tpu.matmul %17, %0, %cst_15 {dimension_numbers = #tpu.dot_dimension_numbers<[1], [0], [0], [1], [0, 0, 1, 1], [], []>} : vector<196x32xbf16>, vector<32x32xbf16>, vector<196x32xf32> -> vector<196x32xf32>
    %19 = arith.addf %18, %4 : vector<196x32xf32>
    %c1_16 = arith.constant 1 : index
    %c0_17 = arith.constant 0 : index
    %c0_18 = arith.constant 0 : index
    %20 = vector.load %arg5[%c1_16, %c0_17, %c0_18] : memref<2x196x32xf32, #tpu.memory_space<vmem>>, vector<1x196x32xf32>
    %21 = vector.shape_cast %20 : vector<1x196x32xf32> to vector<196x32xf32>
    %22 = vector.shape_cast %19 : vector<196x32xf32> to vector<1x196x32xf32>
    tpu.vector_store %arg5[%c1_16, %c0_17, %c0_18], %22 {strides = array<i32>} : memref<2x196x32xf32, #tpu.memory_space<vmem>>, vector<1x196x32xf32>,
    return
  }
  func.func @transform_0(%arg0: i32) -> (i32, i32, i32) {
    %c0_i32 = arith.constant 0 : i32
    %c0_i32_0 = arith.constant 0 : i32
    %c0_i32_1 = arith.constant 0 : i32
    return %arg0, %c0_i32, %c0_i32_0 : i32, i32, i32
  }
  func.func @transform_1(%arg0: i32) -> (i32, i32) {
    %c0_i32 = arith.constant 0 : i32
    %c0_i32_0 = arith.constant 0 : i32
    %c0_i32_1 = arith.constant 0 : i32
    return %c0_i32, %c0_i32_0 : i32, i32
  }
  func.func @transform_2(%arg0: i32) -> (i32, i32) {
    %c0_i32 = arith.constant 0 : i32
    %c0_i32_0 = arith.constant 0 : i32
    %c0_i32_1 = arith.constant 0 : i32
    return %c0_i32, %c0_i32_0 : i32, i32
  }
  func.func @transform_3(%arg0: i32) -> (i32, i32) {
    %c0_i32 = arith.constant 0 : i32
    %c0_i32_0 = arith.constant 0 : i32
    %c0_i32_1 = arith.constant 0 : i32
    return %c0_i32, %c0_i32_0 : i32, i32
  }
  func.func @transform_4(%arg0: i32) -> (i32, i32, i32) {
    %c0_i32 = arith.constant 0 : i32
    %c0_i32_0 = arith.constant 0 : i32
    %c0_i32_1 = arith.constant 0 : i32
    return %arg0, %c0_i32, %c0_i32_0 : i32, i32, i32
  }
}

</mosaic_0001>

<bundles_post_ra>
// kernel: tpu_custom_call.1
= control target key start
LH: loop header
LB: loop body
LE: loop exit
PB: predicated region body
PF: predicated region fallthrough
CT: control target
= control target key end

     0   :  { %9 = vsyncpa [#allocation3], 0  ;;  %s2292_s0 = inlined_call_operand.hbm [shape: bf16[4,32,256], index: 0, kind: input, shape index: {}]   ;;  %s2293_s1 = inlined_call_operand.hbm [shape: bf16[196,256], index: 1, kind: input, shape index: {}]   ;;  %s2294_s2 = inlined_call_operand.hbm [shape: bf16[32,32], index: 2, kind: input, shape index: {}]   ;;  %s2295_s3 = inlined_call_operand.vmem [shape: f32[1,32], index: 3, kind: input, shape index: {}]   ;;  %s2296_s4 = inlined_call_operand.vmem [shape: f32[4,196,32], index: 4, kind: output, shape index: {}]  }
   0x1   :  { %11 = vsyncpa [#allocation3 + $0x1], 0 }
   0x2   :  { %12 = vsyncpa [#allocation5], 0  ;;  %s1793_s15 = smov 0   ;;  %s1795_s16 = smov 0  }
   0x3   :  { %s1797_s17 = smov 0   ;;  %s1799_s18 = smov 0  }
   0x4 LB: > { %s1266_s19 = sadd.s32 4294967295, %s1757_s18   ;;  %p38_p0 = scmp.ne.s32.totalorder %s1749_s16, %s1745_s15  ;;  %s1757_s18 = sphi %s1799_s18, %s2313_s18   ;;  %s1753_s17 = sphi %s1797_s17, %s2312_s17   ;;  %s1749_s16 = sphi %s1795_s16, %s2311_s16   ;;  %s1745_s15 = sphi %s1793_s15, %s2310_s15  }
   0x5   : > { %p1815_p1 = scmp.eq.s32.totalorder %s1266_s19, 0  ;;  %p1268_p2 = scmp.ge.s32.totalorder %s1757_s18, 1 }
   0x6   : > { %p138_p3 = scmp.lt.s32.totalorder %s1757_s18, 3  ;;  %s1759_s23 = smov [#allocation4]  }
   0x7   : > { %s2301_s20 = scalar_select %p1815_p1, 1, 0 }
   0x8   : > { %p1823_p4 = por %p1815_p1, %p38_p0  ;;  %p1827_p5 = pnand %p1268_p2, %p138_p3 }
   0x9   : > { %s150_s24 = sshll.u32 %s1759_s23, 4  ;;  %s1760_s26 = smov [#allocation6]   ;;  %s151_s24 = int_to_ptr.vmem [resolvable:$true] %s150_s24 }
   0xa   : > { %s2302_s21 = scalar_select %p1823_p4, 1, 0 }
   0xb   : > { %s2303_s22 = scalar_select %p1827_p5, 1, 0 }
   0xc   : > { %p1531_p6 = pneg %p1827_p5  ;;  %s163_s27 = sshll.u32 %s1760_s26, 4  ;;  %s164_s27 = int_to_ptr.vmem [resolvable:$true] %s163_s27 }
   0xd   : > { %s1650_s28 = scalar_lea.vmem %s151_s24, 3200  ;;  %p1658_p12 = scmp.lt.s32.totalorder %s151_s24, %s151_s24 }
   0xe   : > { %p1835_p7 = pnand %p1531_p6, %p1815_p1  ;;  %p1651_p9 = scmp.ne.s32.totalorder %s151_s24, %s1650_s28 }
   0xf   : > { %p1659_p13 = scmp.lt.s32.totalorder %s1650_s28, %s1650_s28 }
  0x10   : > { %p1641_p8 = pneg %p1835_p7 }
  0x11   : > { %p1660_p0 = por %p1659_p13, %p1658_p12 }
  0x12   : > { %p1653_p10 = pnand %p1651_p9, %p1641_p8 }
  0x14   : > { %p1654_p11 = pneg %p1653_p10 }
  0x16   : > { %p1661_p2 = pnand %p1660_p0, %p1654_p11 }
  0x18   : > { %1664 = shalt.err (!%p1661_p2)
}
  0x19   : > { %s1761_s29 = smov 128   ;;  %s1762_s30 = smov 8  }
  0x1a   : > { %1534 = dma.hbm_to_vmem [thread:$0]  (!%p1835_p7), %s2293_s1, 3200, %s151_s24, [#allocation5], %s1761_s29, %s1761_s29, %s1762_s30  }
  0x1b   : > { %s1676_s7 = scalar_lea.vmem %s164_s27, 256  ;;  %p1684_p10 = scmp.lt.s32.totalorder %s164_s27, %s164_s27 }
  0x1c   : > { %p1677_p3 = scmp.ne.s32.totalorder %s164_s27, %s1676_s7  ;;  %p1685_p11 = scmp.lt.s32.totalorder %s1676_s7, %s1676_s7 }
  0x1e   : > { %p1679_p6 = pnand %p1677_p3, %p1641_p8  ;;  %p1686_p12 = por %p1685_p11, %p1684_p10 }
  0x20   : > { %p1680_p9 = pneg %p1679_p6 }
  0x22   : > { %p1687_p13 = pnand %p1686_p12, %p1680_p9 }
  0x24   : > { %1690 = shalt.err (!%p1687_p13)
}
  0x25   : > { %s1763_s8 = smov 64   ;;  %s1764_s9 = smov 4  }
  0x26   : > { %1537 = dma.hbm_to_vmem [thread:$0]  (!%p1835_p7), %s2294_s2, 256, %s164_s27, [#allocation5], %s1763_s8, %s1763_s8, %s1764_s9  }
  0x27   : > { %s1861_s12 = sadd.s32 1, %s1757_s18   ;;  %s25_s14 = sadd.s32 1, %s1753_s17 }
  0x28   : > { %s22_s13 = ssub.s32 %s1757_s18, %s1861_s12  ;;  %p32_p0 = scmp.ne.s32.totalorder %s1753_s17, %s1749_s16 }
  0x29   : > { %p23_p8 = scmp.eq.s32.totalorder %s22_s13, 0  ;;  %p33_p2 = scmp.eq.s32.totalorder %s1757_s18, 0 }
  0x2a   : > { %p1544_p6 = scmp.lt.s32.totalorder %s1757_s18, 2  ;;  %s180_s23 = sand.u32 1, %s1753_s17  }
  0x2b   : > { %s1870_s15 = scalar_select %p23_p8, %s1753_s17, %s25_s14  }
  0x2c   : > { %p34_p3 = por %p33_p2, %p32_p0  ;;  %s1377_s24 = sshll.u32 %s1757_s18, 10 }
  0x2d   : > { %s1272_s26 = sshll.u32 %s180_s23, 6  ;;  %s1878_s5 = scalar_lea.hbm %s2292_s0, %s1377_s24 }
  0x2e   : > { %s184_s27 = scalar_lea.vmem [#allocation2], %s1272_s26  ;;  %p1880_p7 = pnand %p1544_p6, %p34_p3 }
  0x2f   : > { %s192_s6 = sshll.u32 %s184_s27, 4  ;;  %s1886_s8 = scalar_lea.sflag [#allocation3], %s180_s23  ;;  %s1884_s6 = int_to_ptr.vmem [resolvable:$true] %s192_s6 }
  0x30   : > { %s1691_s9 = scalar_lea.hbm %s1878_s5, 1024  ;;  %p1693_p10 = pneg %p1880_p7 }
  0x31   : > { %p1692_p9 = scmp.ne.s32.totalorder %s1878_s5, %s1691_s9  ;;  %s1696_s13 = scalar_lea.hbm %s2292_s0, 2048 }
  0x32   : > { %p1697_p13 = scmp.lt.s32.totalorder %s1878_s5, %s2292_s0  ;;  %p1698_p8 = scmp.lt.s32.totalorder %s1696_s13, %s1691_s9 }
  0x33   : > { %p1694_p11 = pnand %p1693_p10, %p1692_p9 }
  0x34   : > { %p1699_p0 = por %p1698_p8, %p1697_p13 }
  0x35   : > { %p1695_p12 = pneg %p1694_p11 }
  0x37   : > { %p1700_p2 = pnand %p1699_p0, %p1695_p12 }
  0x39   : > { %1703 = shalt.err (!%p1700_p2)
}
  0x3a   : > { %s1704_s23 = scalar_lea.vmem %s1884_s6, 1024  ;;  %s1765_s26 = smov [#allocation2]  }
  0x3b   : > { %p1705_p3 = scmp.ne.s32.totalorder %s1884_s6, %s1704_s23  ;;  %s1709_s25 = sshll.u32 %s1765_s26, 4  ;;  %s1710_s25 = int_to_ptr.vmem [resolvable:$false] %s1709_s25 }
  0x3c   : > { %s1711_s28 = scalar_lea.vmem %s1710_s25, 2048  ;;  %p1712_p11 = scmp.lt.s32.totalorder %s1884_s6, %s1710_s25 }
  0x3d   : > { %p1707_p6 = pnand %p1705_p3, %p1693_p10  ;;  %p1713_p1 = scmp.lt.s32.totalorder %s1711_s28, %s1704_s23 }
  0x3f   : > { %p1708_p9 = pneg %p1707_p6  ;;  %p1714_p4 = por %p1713_p1, %p1712_p11 }
  0x41   : > { %p1715_p5 = pnand %p1714_p4, %p1708_p9 }
  0x43   : > { %1718 = shalt.err (!%p1715_p5)
}
  0x44   : > { %1541 = dma.hbm_to_vmem [thread:$0]  (!%p1880_p7), %s1878_s5, 1024, %s1884_s6, %s1886_s8, %s1761_s29, %s1761_s29, %s1762_s30  }
  0x45   : > { %p2306_p10 = scmp.ne.s32.totalorder %s2303_s22, 0 }
  0x46   : > { %s206_s27 = sand.u32 (!%p2306_p10), 1, %s1749_s16   ;;  %p2307_p1 = scmp.ne.s32.totalorder (!%p2306_p10), %s2302_s21, 0 }
  0x47   : > { %204 = sbr.rel (%p2306_p10) target bundleno = 894 (0x37e), region = 36  ;;  %s1277_s9 = sshll.u32 (!%p2306_p10), %s206_s27, 6 }
  0x48   : > { %s207_s10 = scalar_lea.sflag (!%p2306_p10), [#allocation3], %s206_s27  ;;  %s1913_s11 = scalar_lea.vmem (!%p2306_p10), [#allocation2], %s1277_s9 }
  0x4c   : > { %1736 = dma.done.wait (%p2307_p1), %s207_s10, 1024  }
  0x4d   : > { %1738 = vsyncadd (%p2307_p1), %s207_s10, 4294966272  ;;  %p2308_p4 = scmp.ne.s32.totalorder %s2301_s20, 0 }
  0x4f   : > { %1740 = dma.done.wait (%p2308_p4), [#allocation5], 3456  }
  0x50   : > { %1742 = vsyncadd (%p2308_p4), [#allocation5], 4294963840  ;;  %v1766_v0 = vmov 0.0   ;;  %v1587_v1 = vld [vmem:[%s1913_s11 + $0x14] ss:$8 sps:$4 sm:$0xff]   ;;  %v1632_v25 = vld [vmem:[#allocation6] sm:$0xff]  }
  0x51   : > { %1408 = vmatprep.subr.bf16.mxu1 %v1766_v0  ;;  %v1589_v2 = vld [vmem:[%s1913_s11 + $0x10] ss:$8 sps:$4 sm:$0xff]   ;;  %452 = vmatprep.subr.bf16.mxu0 %v1587_v1  ;;  %v1590_v3 = vld [vmem:[%s1913_s11 + $0x4] ss:$8 sps:$4 sm:$0xff]   ;;  %v1592_v5 = vld [vmem:[%s1913_s11] ss:$8 sps:$4 sm:$0xff]  }
  0x52   : > { %453 = vmatpush1.bf16.xpose.msra.mxu0 %v1589_v2  ;;  %v1927_v4 = vld [vmem:[#allocation4 + $0x4] ss:$8 sps:$4 sm:$0xff]   ;;  %v1932_v6 = vld [vmem:[#allocation4] ss:$8 sps:$4 sm:$0xff]   ;;  %v1934_v7 = vld [vmem:[#allocation4 + $0x14] ss:$8 sps:$4 sm:$0xff]  }
  0x53   : > { %454 = vmatprep.subr.bf16.mxu0 %v1590_v3  ;;  %472 = vmatprep.mubr.bf16.mxu0 %v1927_v4  ;;  %v1631_v8 = vld [vmem:[#allocation6 + $0x8] sm:$0xff]   ;;  %v1942_v10 = vld [vmem:[#allocation4 + $0x24] ss:$8 sps:$4 sm:$0xff]   ;;  %v1946_v11 = vld [vmem:[#allocation4 + $0x20] ss:$8 sps:$4 sm:$0xff]   ;;  %vm1767_vm0 = vmmov 0  }
  0x54   : > { %1409 = vmatpush3.bf16.msra.mxu1 %v1631_v8  ;;  %v1938_v9 = vld [vmem:[#allocation4 + $0x10] ss:$8 sps:$4 sm:$0xff]   ;;  %v1948_v12 = vld [vmem:[#allocation4 + $0x34] ss:$8 sps:$4 sm:$0xff]   ;;  %v1954_v14 = vld [vmem:[#allocation4 + $0x44] ss:$8 sps:$4 sm:$0xff]   ;;  %1412 = vmatprep.mubr.msk.bf16.mxu1 %vm1767_vm0, %v1766_v0 }
  0x55   : > { %1410 = vmatprep.subr.bf16.mxu1 %v1766_v0  ;;  %v1952_v13 = vld [vmem:[#allocation4 + $0x30] ss:$8 sps:$4 sm:$0xff]   ;;  %v1958_v15 = vld [vmem:[#allocation4 + $0x40] ss:$8 sps:$4 sm:$0xff]   ;;  %v1960_v16 = vld [vmem:[#allocation4 + $0x54] ss:$8 sps:$4 sm:$0xff]  }
  0x56   : > { %v1964_v17 = vld [vmem:[#allocation4 + $0x50] ss:$8 sps:$4 sm:$0xff]   ;;  %v1966_v18 = vld [vmem:[#allocation4 + $0x64] ss:$8 sps:$4 sm:$0xff]   ;;  %v1970_v19 = vld [vmem:[#allocation4 + $0x60] ss:$8 sps:$4 sm:$0xff]  }
  0x57   : > { %v1972_v20 = vld [vmem:[#allocation4 + $0x74] ss:$8 sps:$4 sm:$0xff]   ;;  %v1976_v21 = vld [vmem:[#allocation4 + $0x70] ss:$8 sps:$4 sm:$0xff]   ;;  %v1978_v22 = vld [vmem:[#allocation4 + $0x84] ss:$8 sps:$4 sm:$0xff]  }
  0x58   : > { %v1982_v23 = vld [vmem:[#allocation4 + $0x80] ss:$8 sps:$4 sm:$0xff]   ;;  %v1984_v24 = vld [vmem:[#allocation4 + $0x94] ss:$8 sps:$4 sm:$0xff]   ;;  %v1988_v26 = vld [vmem:[#allocation4 + $0x90] ss:$8 sps:$4 sm:$0xff]   ;;  %1411 = vmatpush3.bf16.msra.mxu1 %v1632_v25 }
  0x59   : > { %v1990_v27 = vld [vmem:[#allocation4 + $0xa4] ss:$8 sps:$4 sm:$0xff]   ;;  %v1635_v28 = vld [vmem:[%s1913_s11 + $0x34] ss:$8 sps:$4 sm:$0xff]   ;;  %v1997_v29 = vld [vmem:[#allocation4 + $0xa0] ss:$8 sps:$4 sm:$0xff]  }
  0x5a   : > { %455 = vmatpush1.bf16.xpose.msra.mxu0 %v1592_v5  ;;  %840 = vmatprep.subr.bf16.mxu1 %v1635_v28  ;;  %v1999_v30 = vld [vmem:[#allocation4 + $0xb4] ss:$8 sps:$4 sm:$0xff]   ;;  %v281_v31 = vld [vmem:[#allocation4 + $0xc0] sm:$0x33]  ;;  %v2003_v32 = vld [vmem:[#allocation4 + $0xb0] ss:$8 sps:$4 sm:$0xff]  }
  0x5b   : > { %1464 = vmatprep.subr.bf16.mxu0 %v1766_v0  ;;  %v2005_v33 = vcombine.high %v281_v31, %v281_v31  ;;  %v2009_v34 = vcombine.low %v281_v31, %v281_v31  ;;  %v1633_v38 = vld [vmem:[%s1913_s11 + $0x30] ss:$8 sps:$4 sm:$0xff]   ;;  %vm601_vm1 = vcmask 261120   ;;  %v1638_v40 = vld [vmem:[%s1913_s11 + $0x24] ss:$8 sps:$4 sm:$0xff]   ;;  %s1280_s20 = sshll.u32 %s1266_s19, 1 }
  0x5c   : > { %v1636_v45 = vld [vmem:[%s1913_s11 + $0x20] ss:$8 sps:$4 sm:$0xff]   ;;  %p246_p5 = scmp.lt.s32.totalorder %s1280_s20, 3  ;;  %vm801_vm2 = vcmask 257024  }
  0x5e   : > { %s2315_s20 = smov (!%p246_p5, %s1280_s20), 3 }
  0x5f   : > { %s1520_s21 = smul.u32 200, %s2315_s20 }
  0x61   : > { %473 = vmatmul.mubr.bf16.vlgmr.msra.gmra.mxu0 %v1932_v6  ;;  %s2087_s6 = scalar_lea.vmem %s2296_s4, %s1520_s21 }
  0x62   : > { %480 = vmatprep.mubr.bf16.mxu0 %v1934_v7  ;;  %1465 = vmatpush3.bf16.msra.mxu0 %v1631_v8 }
  0x63   : > { %1466 = vmatprep.subr.bf16.mxu0 %v1766_v0 }
  0x66   : > { %1467 = vmatpush3.bf16.msra.mxu0 %v1632_v25 }
  0x69   : > { %481 = vmatmul.mubr.bf16.gmra.mxu0 %v1938_v9 }
  0x6a   : > { %488 = vmatprep.mubr.bf16.mxu0 %v1942_v10 }
  0x71   : > { %489 = vmatmul.mubr.bf16.gmra.mxu0 %v1946_v11 }
  0x72   : > { %496 = vmatprep.mubr.bf16.mxu0 %v1948_v12 }
  0x79   : > { %497 = vmatmul.mubr.bf16.gmra.mxu0 %v1952_v13 }
  0x7a   : > { %504 = vmatprep.mubr.bf16.mxu0 %v1954_v14 }
  0x81   : > { %505 = vmatmul.mubr.bf16.gmra.mxu0 %v1958_v15 }
  0x82   : > { %512 = vmatprep.mubr.bf16.mxu0 %v1960_v16 }
  0x89   : > { %513 = vmatmul.mubr.bf16.gmra.mxu0 %v1964_v17 }
  0x8a   : > { %520 = vmatprep.mubr.bf16.mxu0 %v1966_v18 }
  0x91   : > { %521 = vmatmul.mubr.bf16.gmra.mxu0 %v1970_v19 }
  0x92   : > { %528 = vmatprep.mubr.bf16.mxu0 %v1972_v20 }
  0x99   : > { %529 = vmatmul.mubr.bf16.gmra.mxu0 %v1976_v21 }
  0x9a   : > { %536 = vmatprep.mubr.bf16.mxu0 %v1978_v22 }
  0xa1   : > { %537 = vmatmul.mubr.bf16.gmra.mxu0 %v1982_v23 }
  0xa2   : > { %544 = vmatprep.mubr.bf16.mxu0 %v1984_v24 }
  0xa9   : > { %545 = vmatmul.mubr.bf16.gmra.mxu0 %v1988_v26 }
  0xaa   : > { %552 = vmatprep.mubr.bf16.mxu0 %v1990_v27 }
  0xb1   : > { %553 = vmatmul.mubr.bf16.gmra.mxu0 %v1997_v29 }
  0xb2   : > { %560 = vmatprep.mubr.bf16.mxu0 %v1999_v30 }
  0xb9   : > { %561 = vmatmul.mubr.bf16.gmra.mxu0 %v2003_v32 }
  0xba   : > { %568 = vmatprep.mubr.bf16.mxu0 %v2005_v33 }
  0xc1   : > { %569 = vmatmul.mubr.bf16.gmra.mxu0 %v2009_v34 }
  0xc2   : > { %1468 = vmatprep.mubr.msk.bf16.mxu0 %vm1767_vm0, %v1766_v0 }
 0x121   : > { %v474_v35 = vpop.f32.mrf.mxu0 }
 0x123   : > { %v476_v36 = vpop.f32.mrf.mxu0 }
 0x125   : > { %v477_v37 = vpop.f32.mrf.mxu0 }
 0x126   : > { %v576_v39 = vpack.c.bf16 %v477_v37, %v474_v35 }
 0x127   : > { %v479_v41 = vpop.f32.mrf.mxu0 }
 0x128   : > { %1413 = vmatmul.mubr.msk.bf16.vlgmr.msra.gmra.mxu1 %vm601_vm1, %v576_v39 }
 0x129   : > { %841 = vmatpush1.bf16.xpose.msra.mxu1 %v1633_v38  ;;  %v482_v42 = vpop.f32.mrf.mxu0  ;;  %1416 = vmatprep.mubr.msk.bf16.mxu1 %vm1767_vm0, %v1766_v0 }
 0x12a   : > { %842 = vmatprep.subr.bf16.mxu1 %v1638_v40 }
 0x12b   : > { %v484_v43 = vpop.f32.mrf.mxu0 }
 0x12d   : > { %v485_v44 = vpop.f32.mrf.mxu0 }
 0x12e   : > { %v577_v46 = vpack.c.bf16 %v485_v44, %v482_v42 }
 0x12f   : > { %v487_v47 = vpop.f32.mrf.mxu0 }
 0x130   : > { %1417 = vmatmul.mubr.msk.bf16.gmra.mxu1 %vm601_vm1, %v577_v46 }
 0x131   : > { %v490_v48 = vpop.f32.mrf.mxu0  ;;  %1420 = vmatprep.mubr.msk.bf16.mxu1 %vm1767_vm0, %v1766_v0  ;;  %843 = vmatpush1.bf16.xpose.msra.mxu1 %v1636_v45 }
 0x133   : > { %v492_v49 = vpop.f32.mrf.mxu0 }
 0x135   : > { %v493_v50 = vpop.f32.mrf.mxu0 }
 0x136   : > { %v578_v51 = vpack.c.bf16 %v493_v50, %v490_v48 }
 0x137   : > { %v495_v52 = vpop.f32.mrf.mxu0 }
 0x138   : > { %1421 = vmatmul.mubr.msk.bf16.gmra.mxu1 %vm601_vm1, %v578_v51 }
 0x139   : > { %v498_v53 = vpop.f32.mrf.mxu0  ;;  %1424 = vmatprep.mubr.msk.bf16.mxu1 %vm1767_vm0, %v1766_v0 }
 0x13b   : > { %v500_v54 = vpop.f32.mrf.mxu0 }
 0x13d   : > { %v501_v55 = vpop.f32.mrf.mxu0 }
 0x13e   : > { %v579_v56 = vpack.c.bf16 %v501_v55, %v498_v53 }
 0x13f   : > { %v503_v57 = vpop.f32.mrf.mxu0 }
 0x140   : > { %1425 = vmatmul.mubr.msk.bf16.gmra.mxu1 %vm601_vm1, %v579_v56 }
 0x141   : > { %v506_v58 = vpop.f32.mrf.mxu0  ;;  %1428 = vmatprep.mubr.msk.bf16.mxu1 %vm1767_vm0, %v1766_v0 }
 0x143   : > { %v508_v59 = vpop.f32.mrf.mxu0 }
 0x145   : > { %v509_v60 = vpop.f32.mrf.mxu0 }
 0x146   : > { %v580_v61 = vpack.c.bf16 %v509_v60, %v506_v58 }
 0x147   : > { %v511_v62 = vpop.f32.mrf.mxu0 }
 0x148   : > { %1429 = vmatmul.mubr.msk.bf16.gmra.mxu1 %vm601_vm1, %v580_v61 }
 0x149   : > { %v514_v63 = vpop.f32.mrf.mxu0  ;;  %1432 = vmatprep.mubr.msk.bf16.mxu1 %vm1767_vm0, %v1766_v0 }
 0x14b   : > { %v516_v1 = vpop.f32.mrf.mxu0 }
 0x14d   : > { %v517_v2 = vpop.f32.mrf.mxu0 }
 0x14e   : > { %v581_v3 = vpack.c.bf16 %v517_v2, %v514_v63 }
 0x14f   : > { %v519_v5 = vpop.f32.mrf.mxu0 }
 0x150   : > { %1433 = vmatmul.mubr.msk.bf16.gmra.mxu1 %vm601_vm1, %v581_v3 }
 0x151   : > { %v522_v8 = vpop.f32.mrf.mxu0  ;;  %1436 = vmatprep.mubr.msk.bf16.mxu1 %vm1767_vm0, %v1766_v0 }
 0x153   : > { %v524_v25 = vpop.f32.mrf.mxu0 }
 0x155   : > { %v525_v28 = vpop.f32.mrf.mxu0 }
 0x156   : > { %v582_v31 = vpack.c.bf16 %v525_v28, %v522_v8 }
 0x157   : > { %v527_v35 = vpop.f32.mrf.mxu0 }
 0x158   : > { %1437 = vmatmul.mubr.msk.bf16.gmra.mxu1 %vm601_vm1, %v582_v31 }
 0x159   : > { %v530_v36 = vpop.f32.mrf.mxu0  ;;  %1440 = vmatprep.mubr.msk.bf16.mxu1 %vm1767_vm0, %v1766_v0 }
 0x15b   : > { %v532_v37 = vpop.f32.mrf.mxu0 }
 0x15d   : > { %v533_v38 = vpop.f32.mrf.mxu0 }
 0x15e   : > { %v583_v39 = vpack.c.bf16 %v533_v38, %v530_v36 }
 0x15f   : > { %v535_v40 = vpop.f32.mrf.mxu0 }
 0x160   : > { %1441 = vmatmul.mubr.msk.bf16.gmra.mxu1 %vm601_vm1, %v583_v39 }
 0x161   : > { %v538_v41 = vpop.f32.mrf.mxu0  ;;  %1444 = vmatprep.mubr.msk.bf16.mxu1 %vm1767_vm0, %v1766_v0 }
 0x163   : > { %v540_v42 = vpop.f32.mrf.mxu0 }
 0x165   : > { %v541_v43 = vpop.f32.mrf.mxu0 }
 0x166   : > { %v584_v44 = vpack.c.bf16 %v541_v43, %v538_v41 }
 0x167   : > { %v543_v45 = vpop.f32.mrf.mxu0 }
 0x168   : > { %1445 = vmatmul.mubr.msk.bf16.gmra.mxu1 %vm601_vm1, %v584_v44 }
 0x169   : > { %v546_v46 = vpop.f32.mrf.mxu0  ;;  %1448 = vmatprep.mubr.msk.bf16.mxu1 %vm1767_vm0, %v1766_v0 }
 0x16b   : > { %v548_v47 = vpop.f32.mrf.mxu0 }
 0x16d   : > { %v549_v48 = vpop.f32.mrf.mxu0 }
 0x16e   : > { %v585_v49 = vpack.c.bf16 %v549_v48, %v546_v46 }
 0x16f   : > { %v551_v50 = vpop.f32.mrf.mxu0 }
 0x170   : > { %1449 = vmatmul.mubr.msk.bf16.gmra.mxu1 %vm601_vm1, %v585_v49 }
 0x171   : > { %v554_v51 = vpop.f32.mrf.mxu0  ;;  %1452 = vmatprep.mubr.msk.bf16.mxu1 %vm1767_vm0, %v1766_v0 }
 0x173   : > { %v556_v52 = vpop.f32.mrf.mxu0 }
 0x175   : > { %v557_v53 = vpop.f32.mrf.mxu0 }
 0x176   : > { %v586_v54 = vpack.c.bf16 %v557_v53, %v554_v51 }
 0x177   : > { %v559_v55 = vpop.f32.mrf.mxu0 }
 0x178   : > { %1453 = vmatmul.mubr.msk.bf16.gmra.mxu1 %vm601_vm1, %v586_v54 }
 0x179   : > { %v562_v56 = vpop.f32.mrf.mxu0  ;;  %1456 = vmatprep.mubr.msk.bf16.mxu1 %vm1767_vm0, %v1766_v0 }
 0x17b   : > { %v564_v57 = vpop.f32.mrf.mxu0 }
 0x17d   : > { %v565_v58 = vpop.f32.mrf.mxu0 }
 0x17e   : > { %v587_v59 = vpack.c.bf16 %v565_v58, %v562_v56 }
 0x17f   : > { %v567_v60 = vpop.f32.mrf.mxu0 }
 0x180   : > { %1457 = vmatmul.mubr.msk.bf16.gmra.mxu1 %vm601_vm1, %v587_v59 }
 0x181   : > { %v570_v61 = vpop.f32.mrf.mxu0  ;;  %1460 = vmatprep.mubr.msk.bf16.mxu1 %vm1767_vm0, %v1766_v0 }
 0x182   : > { %v588_v63 = vpack.c.bf16 %v570_v61, %v570_v61 }
 0x183   : > { %v572_v62 = vpop.f32.mrf.mxu0 }
 0x185   : > { %v573_v1 = vpop.f32.mrf.mxu0 }
 0x187   : > { %v574_v2 = vpop.f32.mrf.mxu0 }
 0x188   : > { %1461 = vmatmul.mubr.msk.bf16.gmra.mxu1 %vm601_vm1, %v588_v63 }
 0x189   : > { %860 = vmatprep.mubr.bf16.mxu1 %v1927_v4  ;;  %v2082_v4 = vld [vmem:[%s2295_s3] ss:$0 sm:$0xff] }
 0x190   : > { %861 = vmatmul.mubr.bf16.vlgmr.msra.gmra.mxu1 %v1932_v6 }
 0x191   : > { %868 = vmatprep.mubr.bf16.mxu1 %v1934_v7 }
 0x198   : > { %869 = vmatmul.mubr.bf16.gmra.mxu1 %v1938_v9 }
 0x199   : > { %876 = vmatprep.mubr.bf16.mxu1 %v1942_v10 }
 0x1a0   : > { %877 = vmatmul.mubr.bf16.gmra.mxu1 %v1946_v11 }
 0x1a1   : > { %884 = vmatprep.mubr.bf16.mxu1 %v1948_v12 }
 0x1a8   : > { %885 = vmatmul.mubr.bf16.gmra.mxu1 %v1952_v13 }
 0x1a9   : > { %892 = vmatprep.mubr.bf16.mxu1 %v1954_v14 }
 0x1b0   : > { %893 = vmatmul.mubr.bf16.gmra.mxu1 %v1958_v15 }
 0x1b1   : > { %900 = vmatprep.mubr.bf16.mxu1 %v1960_v16 }
 0x1b8   : > { %901 = vmatmul.mubr.bf16.gmra.mxu1 %v1964_v17 }
 0x1b9   : > { %908 = vmatprep.mubr.bf16.mxu1 %v1966_v18 }
 0x1c0   : > { %909 = vmatmul.mubr.bf16.gmra.mxu1 %v1970_v19 }
 0x1c1   : > { %916 = vmatprep.mubr.bf16.mxu1 %v1972_v20 }
 0x1c8   : > { %917 = vmatmul.mubr.bf16.gmra.mxu1 %v1976_v21 }
 0x1c9   : > { %924 = vmatprep.mubr.bf16.mxu1 %v1978_v22 }
 0x1d0   : > { %925 = vmatmul.mubr.bf16.gmra.mxu1 %v1982_v23 }
 0x1d1   : > { %932 = vmatprep.mubr.bf16.mxu1 %v1984_v24 }
 0x1d8   : > { %933 = vmatmul.mubr.bf16.gmra.mxu1 %v1988_v26 }
 0x1d9   : > { %940 = vmatprep.mubr.bf16.mxu1 %v1990_v27 }
 0x1e0   : > { %941 = vmatmul.mubr.bf16.gmra.mxu1 %v1997_v29 }
 0x1e1   : > { %948 = vmatprep.mubr.bf16.mxu1 %v1999_v30 }
 0x1e8   : > { %v675_v6 = vpop.f32.mrf.mxu1  ;;  %949 = vmatmul.mubr.bf16.gmra.mxu1 %v2003_v32 }
 0x1e9   : > { %v676_v7 = vadd.f32 %v2082_v4, %v675_v6  ;;  %956 = vmatprep.mubr.bf16.mxu1 %v2005_v33 }
 0x1ea   : > { %v1414_v9 = vpop.f32.mrf.mxu1 }
 0x1eb   : > { %777 = vst.msk [vmem:[%s2087_s6] sm:$0xff] %vm601_vm1, %v676_v7 }
 0x1ec   : > { %v678_v10 = vpop.f32.mrf.mxu1 }
 0x1ed   : > { %v679_v11 = vadd.f32 %v2082_v4, %v678_v10 }
 0x1ee   : > { %v1415_v12 = vpop.f32.mrf.mxu1 }
 0x1ef   : > { %778 = vst.msk [vmem:[%s2087_s6 + $0x8] sm:$0xff] %vm601_vm1, %v679_v11 }
 0x1f0   : > { %v683_v13 = vpop.f32.mrf.mxu1  ;;  %957 = vmatmul.mubr.bf16.gmra.mxu1 %v2009_v34 }
 0x1f1   : > { %v684_v14 = vadd.f32 %v2082_v4, %v683_v13 }
 0x1f2   : > { %v1418_v15 = vpop.f32.mrf.mxu1 }
 0x1f3   : > { %779 = vst.msk [vmem:[%s2087_s6 + $0x10] sm:$0xff] %vm601_vm1, %v684_v14 }
 0x1f4   : > { %v686_v16 = vpop.f32.mrf.mxu1 }
 0x1f5   : > { %v687_v17 = vadd.f32 %v2082_v4, %v686_v16 }
 0x1f6   : > { %v1419_v18 = vpop.f32.mrf.mxu1 }
 0x1f7   : > { %780 = vst.msk [vmem:[%s2087_s6 + $0x18] sm:$0xff] %vm601_vm1, %v687_v17 }
 0x1f8   : > { %v691_v19 = vpop.f32.mrf.mxu1 }
 0x1f9   : > { %v692_v20 = vadd.f32 %v2082_v4, %v691_v19 }
 0x1fa   : > { %v1422_v21 = vpop.f32.mrf.mxu1 }
 0x1fb   : > { %781 = vst.msk [vmem:[%s2087_s6 + $0x20] sm:$0xff] %vm601_vm1, %v692_v20 }
 0x1fc   : > { %v694_v22 = vpop.f32.mrf.mxu1 }
 0x1fd   : > { %v695_v23 = vadd.f32 %v2082_v4, %v694_v22 }
 0x1fe   : > { %v1423_v24 = vpop.f32.mrf.mxu1 }
 0x1ff   : > { %782 = vst.msk [vmem:[%s2087_s6 + $0x28] sm:$0xff] %vm601_vm1, %v695_v23 }
 0x200   : > { %v699_v26 = vpop.f32.mrf.mxu1 }
 0x201   : > { %v700_v27 = vadd.f32 %v2082_v4, %v699_v26 }
 0x202   : > { %v1426_v29 = vpop.f32.mrf.mxu1 }
 0x203   : > { %783 = vst.msk [vmem:[%s2087_s6 + $0x30] sm:$0xff] %vm601_vm1, %v700_v27 }
 0x204   : > { %v702_v30 = vpop.f32.mrf.mxu1 }
 0x205   : > { %v703_v32 = vadd.f32 %v2082_v4, %v702_v30 }
 0x206   : > { %v1427_v33 = vpop.f32.mrf.mxu1 }
 0x207   : > { %784 = vst.msk [vmem:[%s2087_s6 + $0x38] sm:$0xff] %vm601_vm1, %v703_v32 }
 0x208   : > { %v707_v34 = vpop.f32.mrf.mxu1 }
 0x209   : > { %v708_v3 = vadd.f32 %v2082_v4, %v707_v34 }
 0x20a   : > { %v1430_v5 = vpop.f32.mrf.mxu1 }
 0x20b   : > { %785 = vst.msk [vmem:[%s2087_s6 + $0x40] sm:$0xff] %vm601_vm1, %v708_v3 }
 0x20c   : > { %v710_v8 = vpop.f32.mrf.mxu1 }
 0x20d   : > { %v711_v25 = vadd.f32 %v2082_v4, %v710_v8 }
 0x20e   : > { %v1431_v28 = vpop.f32.mrf.mxu1 }
 0x20f   : > { %786 = vst.msk [vmem:[%s2087_s6 + $0x48] sm:$0xff] %vm601_vm1, %v711_v25 }
 0x210   : > { %v715_v31 = vpop.f32.mrf.mxu1 }
 0x211   : > { %v716_v35 = vadd.f32 %v2082_v4, %v715_v31 }
 0x212   : > { %v1434_v36 = vpop.f32.mrf.mxu1 }
 0x213   : > { %787 = vst.msk [vmem:[%s2087_s6 + $0x50] sm:$0xff] %vm601_vm1, %v716_v35 }
 0x214   : > { %v718_v37 = vpop.f32.mrf.mxu1 }
 0x215   : > { %v719_v38 = vadd.f32 %v2082_v4, %v718_v37 }
 0x216   : > { %v1435_v39 = vpop.f32.mrf.mxu1 }
 0x217   : > { %788 = vst.msk [vmem:[%s2087_s6 + $0x58] sm:$0xff] %vm601_vm1, %v719_v38 }
 0x218   : > { %v723_v40 = vpop.f32.mrf.mxu1 }
 0x219   : > { %v724_v41 = vadd.f32 %v2082_v4, %v723_v40 }
 0x21a   : > { %v1438_v42 = vpop.f32.mrf.mxu1 }
 0x21b   : > { %789 = vst.msk [vmem:[%s2087_s6 + $0x60] sm:$0xff] %vm601_vm1, %v724_v41 }
 0x21c   : > { %v726_v43 = vpop.f32.mrf.mxu1 }
 0x21d   : > { %v727_v44 = vadd.f32 %v2082_v4, %v726_v43 }
 0x21e   : > { %v1439_v45 = vpop.f32.mrf.mxu1 }
 0x21f   : > { %790 = vst.msk [vmem:[%s2087_s6 + $0x68] sm:$0xff] %vm601_vm1, %v727_v44 }
 0x220   : > { %v731_v46 = vpop.f32.mrf.mxu1 }
 0x221   : > { %v732_v47 = vadd.f32 %v2082_v4, %v731_v46 }
 0x222   : > { %v1442_v48 = vpop.f32.mrf.mxu1 }
 0x223   : > { %791 = vst.msk [vmem:[%s2087_s6 + $0x70] sm:$0xff] %vm601_vm1, %v732_v47 }
 0x224   : > { %v734_v49 = vpop.f32.mrf.mxu1 }
 0x225   : > { %v735_v50 = vadd.f32 %v2082_v4, %v734_v49 }
 0x226   : > { %v1443_v51 = vpop.f32.mrf.mxu1 }
 0x227   : > { %792 = vst.msk [vmem:[%s2087_s6 + $0x78] sm:$0xff] %vm601_vm1, %v735_v50 }
 0x228   : > { %v739_v52 = vpop.f32.mrf.mxu1 }
 0x229   : > { %v740_v53 = vadd.f32 %v2082_v4, %v739_v52 }
 0x22a   : > { %v1446_v54 = vpop.f32.mrf.mxu1 }
 0x22b   : > { %793 = vst.msk [vmem:[%s2087_s6 + $0x80] sm:$0xff] %vm601_vm1, %v740_v53 }
 0x22c   : > { %v742_v55 = vpop.f32.mrf.mxu1 }
 0x22d   : > { %v743_v56 = vadd.f32 %v2082_v4, %v742_v55 }
 0x22e   : > { %v1447_v57 = vpop.f32.mrf.mxu1 }
 0x22f   : > { %794 = vst.msk [vmem:[%s2087_s6 + $0x88] sm:$0xff] %vm601_vm1, %v743_v56 }
 0x230   : > { %v747_v58 = vpop.f32.mrf.mxu1 }
 0x231   : > { %v748_v59 = vadd.f32 %v2082_v4, %v747_v58 }
 0x232   : > { %v1450_v60 = vpop.f32.mrf.mxu1 }
 0x233   : > { %795 = vst.msk [vmem:[%s2087_s6 + $0x90] sm:$0xff] %vm601_vm1, %v748_v59 }
 0x234   : > { %v750_v61 = vpop.f32.mrf.mxu1 }
 0x235   : > { %v751_v62 = vadd.f32 %v2082_v4, %v750_v61 }
 0x236   : > { %v1451_v63 = vpop.f32.mrf.mxu1 }
 0x237   : > { %796 = vst.msk [vmem:[%s2087_s6 + $0x98] sm:$0xff] %vm601_vm1, %v751_v62 }
 0x238   : > { %v755_v1 = vpop.f32.mrf.mxu1 }
 0x239   : > { %v756_v2 = vadd.f32 %v2082_v4, %v755_v1 }
 0x23a   : > { %v1454_v6 = vpop.f32.mrf.mxu1 }
 0x23b   : > { %797 = vst.msk [vmem:[%s2087_s6 + $0xa0] sm:$0xff] %vm601_vm1, %v756_v2 }
 0x23c   : > { %v758_v7 = vpop.f32.mrf.mxu1 }
 0x23d   : > { %v759_v9 = vadd.f32 %v2082_v4, %v758_v7 }
 0x23e   : > { %v1455_v10 = vpop.f32.mrf.mxu1 }
 0x23f   : > { %798 = vst.msk [vmem:[%s2087_s6 + $0xa8] sm:$0xff] %vm601_vm1, %v759_v9 }
 0x240   : > { %v763_v11 = vpop.f32.mrf.mxu1 }
 0x241   : > { %v764_v12 = vadd.f32 %v2082_v4, %v763_v11 }
 0x242   : > { %v1458_v13 = vpop.f32.mrf.mxu1 }
 0x243   : > { %799 = vst.msk [vmem:[%s2087_s6 + $0xb0] sm:$0xff] %vm601_vm1, %v764_v12 }
 0x244   : > { %v766_v14 = vpop.f32.mrf.mxu1 }
 0x245   : > { %v767_v15 = vadd.f32 %v2082_v4, %v766_v14 }
 0x246   : > { %v1459_v16 = vpop.f32.mrf.mxu1 }
 0x247   : > { %800 = vst.msk [vmem:[%s2087_s6 + $0xb8] sm:$0xff] %vm601_vm1, %v767_v15 }
 0x248   : > { %v771_v17 = vpop.f32.mrf.mxu1 }
 0x249   : > { %v772_v18 = vadd.f32 %v2082_v4, %v771_v17 }
 0x24a   : > { %v1462_v19 = vpop.f32.mrf.mxu1 }
 0x24b   : > { %802 = vst.msk [vmem:[%s2087_s6 + $0xc0] sm:$0xf] %vm801_vm2, %v772_v18 }
 0x24c   : > { %v774_v20 = vpop.f32.mrf.mxu1 }
 0x24e   : > { %v1463_v21 = vpop.f32.mrf.mxu1 }
 0x250   : > { %v862_v22 = vpop.f32.mrf.mxu1 }
 0x252   : > { %v864_v23 = vpop.f32.mrf.mxu1 }
 0x254   : > { %v865_v24 = vpop.f32.mrf.mxu1 }
 0x255   : > { %v964_v26 = vpack.c.bf16 %v865_v24, %v862_v22 }
 0x256   : > { %v867_v27 = vpop.f32.mrf.mxu1 }
 0x257   : > { %1469 = vmatmul.mubr.msk.bf16.vlgmr.msra.gmra.mxu0 %vm601_vm1, %v964_v26 }
 0x258   : > { %v870_v29 = vpop.f32.mrf.mxu1  ;;  %1472 = vmatprep.mubr.msk.bf16.mxu0 %vm1767_vm0, %v1766_v0 }
 0x25a   : > { %v872_v30 = vpop.f32.mrf.mxu1 }
 0x25c   : > { %v873_v32 = vpop.f32.mrf.mxu1 }
 0x25d   : > { %v965_v33 = vpack.c.bf16 %v873_v32, %v870_v29 }
 0x25e   : > { %v875_v34 = vpop.f32.mrf.mxu1 }
 0x25f   : > { %1473 = vmatmul.mubr.msk.bf16.gmra.mxu0 %vm601_vm1, %v965_v33 }
 0x260   : > { %v878_v3 = vpop.f32.mrf.mxu1  ;;  %1476 = vmatprep.mubr.msk.bf16.mxu0 %vm1767_vm0, %v1766_v0 }
 0x262   : > { %v880_v5 = vpop.f32.mrf.mxu1 }
 0x264   : > { %v881_v8 = vpop.f32.mrf.mxu1 }
 0x265   : > { %v966_v25 = vpack.c.bf16 %v881_v8, %v878_v3 }
 0x266   : > { %v883_v28 = vpop.f32.mrf.mxu1 }
 0x267   : > { %1477 = vmatmul.mubr.msk.bf16.gmra.mxu0 %vm601_vm1, %v966_v25 }
 0x268   : > { %v886_v31 = vpop.f32.mrf.mxu1  ;;  %1480 = vmatprep.mubr.msk.bf16.mxu0 %vm1767_vm0, %v1766_v0 }
 0x26a   : > { %v888_v35 = vpop.f32.mrf.mxu1 }
 0x26c   : > { %v889_v36 = vpop.f32.mrf.mxu1 }
 0x26d   : > { %v967_v37 = vpack.c.bf16 %v889_v36, %v886_v31 }
 0x26e   : > { %v891_v38 = vpop.f32.mrf.mxu1 }
 0x26f   : > { %1481 = vmatmul.mubr.msk.bf16.gmra.mxu0 %vm601_vm1, %v967_v37 }
 0x270   : > { %v894_v39 = vpop.f32.mrf.mxu1  ;;  %1484 = vmatprep.mubr.msk.bf16.mxu0 %vm1767_vm0, %v1766_v0 }
 0x272   : > { %v896_v40 = vpop.f32.mrf.mxu1 }
 0x274   : > { %v897_v41 = vpop.f32.mrf.mxu1 }
 0x275   : > { %v968_v42 = vpack.c.bf16 %v897_v41, %v894_v39 }
 0x276   : > { %v899_v43 = vpop.f32.mrf.mxu1 }
 0x277   : > { %1485 = vmatmul.mubr.msk.bf16.gmra.mxu0 %vm601_vm1, %v968_v42 }
 0x278   : > { %v902_v44 = vpop.f32.mrf.mxu1  ;;  %1488 = vmatprep.mubr.msk.bf16.mxu0 %vm1767_vm0, %v1766_v0 }
 0x27a   : > { %v904_v45 = vpop.f32.mrf.mxu1 }
 0x27c   : > { %v905_v46 = vpop.f32.mrf.mxu1 }
 0x27d   : > { %v969_v47 = vpack.c.bf16 %v905_v46, %v902_v44 }
 0x27e   : > { %v907_v48 = vpop.f32.mrf.mxu1 }
 0x27f   : > { %1489 = vmatmul.mubr.msk.bf16.gmra.mxu0 %vm601_vm1, %v969_v47 }
 0x280   : > { %v910_v49 = vpop.f32.mrf.mxu1  ;;  %1492 = vmatprep.mubr.msk.bf16.mxu0 %vm1767_vm0, %v1766_v0 }
 0x282   : > { %v912_v50 = vpop.f32.mrf.mxu1 }
 0x284   : > { %v913_v51 = vpop.f32.mrf.mxu1 }
 0x285   : > { %v970_v52 = vpack.c.bf16 %v913_v51, %v910_v49 }
 0x286   : > { %v915_v53 = vpop.f32.mrf.mxu1 }
 0x287   : > { %1493 = vmatmul.mubr.msk.bf16.gmra.mxu0 %vm601_vm1, %v970_v52 }
 0x288   : > { %v918_v54 = vpop.f32.mrf.mxu1  ;;  %1496 = vmatprep.mubr.msk.bf16.mxu0 %vm1767_vm0, %v1766_v0 }
 0x28a   : > { %v920_v55 = vpop.f32.mrf.mxu1 }
 0x28c   : > { %v921_v56 = vpop.f32.mrf.mxu1 }
 0x28d   : > { %v971_v57 = vpack.c.bf16 %v921_v56, %v918_v54 }
 0x28e   : > { %v923_v58 = vpop.f32.mrf.mxu1 }
 0x28f   : > { %1497 = vmatmul.mubr.msk.bf16.gmra.mxu0 %vm601_vm1, %v971_v57 }
 0x290   : > { %v926_v59 = vpop.f32.mrf.mxu1  ;;  %1500 = vmatprep.mubr.msk.bf16.mxu0 %vm1767_vm0, %v1766_v0 }
 0x292   : > { %v928_v60 = vpop.f32.mrf.mxu1 }
 0x294   : > { %v929_v61 = vpop.f32.mrf.mxu1 }
 0x295   : > { %v972_v62 = vpack.c.bf16 %v929_v61, %v926_v59 }
 0x296   : > { %v931_v63 = vpop.f32.mrf.mxu1 }
 0x297   : > { %1501 = vmatmul.mubr.msk.bf16.gmra.mxu0 %vm601_vm1, %v972_v62 }
 0x298   : > { %v934_v1 = vpop.f32.mrf.mxu1  ;;  %1504 = vmatprep.mubr.msk.bf16.mxu0 %vm1767_vm0, %v1766_v0 }
 0x29a   : > { %v936_v2 = vpop.f32.mrf.mxu1 }
 0x29c   : > { %v937_v6 = vpop.f32.mrf.mxu1 }
 0x29d   : > { %v973_v7 = vpack.c.bf16 %v937_v6, %v934_v1 }
 0x29e   : > { %v939_v9 = vpop.f32.mrf.mxu1 }
 0x29f   : > { %1505 = vmatmul.mubr.msk.bf16.gmra.mxu0 %vm601_vm1, %v973_v7 }
 0x2a0   : > { %v942_v10 = vpop.f32.mrf.mxu1  ;;  %1508 = vmatprep.mubr.msk.bf16.mxu0 %vm1767_vm0, %v1766_v0 }
 0x2a2   : > { %v944_v11 = vpop.f32.mrf.mxu1 }
 0x2a4   : > { %v945_v12 = vpop.f32.mrf.mxu1 }
 0x2a5   : > { %v974_v13 = vpack.c.bf16 %v945_v12, %v942_v10 }
 0x2a6   : > { %v947_v14 = vpop.f32.mrf.mxu1 }
 0x2a7   : > { %1509 = vmatmul.mubr.msk.bf16.gmra.mxu0 %vm601_vm1, %v974_v13 }
 0x2a8   : > { %v950_v15 = vpop.f32.mrf.mxu1  ;;  %1512 = vmatprep.mubr.msk.bf16.mxu0 %vm1767_vm0, %v1766_v0 }
 0x2aa   : > { %v952_v16 = vpop.f32.mrf.mxu1 }
 0x2ac   : > { %v953_v17 = vpop.f32.mrf.mxu1 }
 0x2ad   : > { %v975_v18 = vpack.c.bf16 %v953_v17, %v950_v15 }
 0x2ae   : > { %v955_v19 = vpop.f32.mrf.mxu1 }
 0x2af   : > { %1513 = vmatmul.mubr.msk.bf16.gmra.mxu0 %vm601_vm1, %v975_v18 }
 0x2b0   : > { %v958_v20 = vpop.f32.mrf.mxu1  ;;  %1516 = vmatprep.mubr.msk.bf16.mxu0 %vm1767_vm0, %v1766_v0 }
 0x2b1   : > { %v976_v22 = vpack.c.bf16 %v958_v20, %v958_v20 }
 0x2b2   : > { %v960_v21 = vpop.f32.mrf.mxu1 }
 0x2b4   : > { %v961_v23 = vpop.f32.mrf.mxu1 }
 0x2b6   : > { %v962_v24 = vpop.f32.mrf.mxu1 }
 0x2b7   : > { %1517 = vmatmul.mubr.msk.bf16.gmra.mxu0 %vm601_vm1, %v976_v22 }
 0x317   : > { %v1050_v26 = vpop.f32.mrf.mxu0 }
 0x318   : > { %v1051_v27 = vadd.f32 %v2082_v4, %v1050_v26 }
 0x319   : > { %v1470_v29 = vpop.f32.mrf.mxu0 }
 0x31a   : > { %1349 = vst.msk [vmem:[%s2087_s6 + $0xc8] sm:$0xff] %vm601_vm1, %v1051_v27 }
 0x31b   : > { %v1053_v30 = vpop.f32.mrf.mxu0 }
 0x31c   : > { %v1054_v32 = vadd.f32 %v2082_v4, %v1053_v30 }
 0x31d   : > { %v1471_v33 = vpop.f32.mrf.mxu0 }
 0x31e   : > { %1350 = vst.msk [vmem:[%s2087_s6 + $0xd0] sm:$0xff] %vm601_vm1, %v1054_v32 }
 0x31f   : > { %v1058_v0 = vpop.f32.mrf.mxu0 }
 0x320   : > { %v1059_v34 = vadd.f32 %v2082_v4, %v1058_v0 }
 0x321   : > { %v1474_v3 = vpop.f32.mrf.mxu0 }
 0x322   : > { %1351 = vst.msk [vmem:[%s2087_s6 + $0xd8] sm:$0xff] %vm601_vm1, %v1059_v34 }
 0x323   : > { %v1061_v5 = vpop.f32.mrf.mxu0 }
 0x324   : > { %v1062_v8 = vadd.f32 %v2082_v4, %v1061_v5 }
 0x325   : > { %v1475_v25 = vpop.f32.mrf.mxu0 }
 0x326   : > { %1352 = vst.msk [vmem:[%s2087_s6 + $0xe0] sm:$0xff] %vm601_vm1, %v1062_v8 }
 0x327   : > { %v1066_v28 = vpop.f32.mrf.mxu0 }
 0x328   : > { %v1067_v31 = vadd.f32 %v2082_v4, %v1066_v28 }
 0x329   : > { %v1478_v35 = vpop.f32.mrf.mxu0 }
 0x32a   : > { %1353 = vst.msk [vmem:[%s2087_s6 + $0xe8] sm:$0xff] %vm601_vm1, %v1067_v31 }
 0x32b   : > { %v1069_v36 = vpop.f32.mrf.mxu0 }
 0x32c   : > { %v1070_v37 = vadd.f32 %v2082_v4, %v1069_v36 }
 0x32d   : > { %v1479_v38 = vpop.f32.mrf.mxu0 }
 0x32e   : > { %1354 = vst.msk [vmem:[%s2087_s6 + $0xf0] sm:$0xff] %vm601_vm1, %v1070_v37 }
 0x32f   : > { %v1074_v39 = vpop.f32.mrf.mxu0 }
 0x330   : > { %v1075_v40 = vadd.f32 %v2082_v4, %v1074_v39 }
 0x331   : > { %v1482_v41 = vpop.f32.mrf.mxu0 }
 0x332   : > { %1355 = vst.msk [vmem:[%s2087_s6 + $0xf8] sm:$0xff] %vm601_vm1, %v1075_v40 }
 0x333   : > { %v1077_v42 = vpop.f32.mrf.mxu0 }
 0x334   : > { %v1078_v43 = vadd.f32 %v2082_v4, %v1077_v42 }
 0x335   : > { %v1483_v44 = vpop.f32.mrf.mxu0 }
 0x336   : > { %1356 = vst.msk [vmem:[%s2087_s6 + $0x100] sm:$0xff] %vm601_vm1, %v1078_v43 }
 0x337   : > { %v1082_v45 = vpop.f32.mrf.mxu0 }
 0x338   : > { %v1083_v46 = vadd.f32 %v2082_v4, %v1082_v45 }
 0x339   : > { %v1486_v47 = vpop.f32.mrf.mxu0 }
 0x33a   : > { %1357 = vst.msk [vmem:[%s2087_s6 + $0x108] sm:$0xff] %vm601_vm1, %v1083_v46 }
 0x33b   : > { %v1085_v48 = vpop.f32.mrf.mxu0 }
 0x33c   : > { %v1086_v49 = vadd.f32 %v2082_v4, %v1085_v48 }
 0x33d   : > { %v1487_v50 = vpop.f32.mrf.mxu0 }
 0x33e   : > { %1358 = vst.msk [vmem:[%s2087_s6 + $0x110] sm:$0xff] %vm601_vm1, %v1086_v49 }
 0x33f   : > { %v1090_v51 = vpop.f32.mrf.mxu0 }
 0x340   : > { %v1091_v52 = vadd.f32 %v2082_v4, %v1090_v51 }
 0x341   : > { %v1490_v53 = vpop.f32.mrf.mxu0 }
 0x342   : > { %1359 = vst.msk [vmem:[%s2087_s6 + $0x118] sm:$0xff] %vm601_vm1, %v1091_v52 }
 0x343   : > { %v1093_v54 = vpop.f32.mrf.mxu0 }
 0x344   : > { %v1094_v55 = vadd.f32 %v2082_v4, %v1093_v54 }
 0x345   : > { %v1491_v56 = vpop.f32.mrf.mxu0 }
 0x346   : > { %1360 = vst.msk [vmem:[%s2087_s6 + $0x120] sm:$0xff] %vm601_vm1, %v1094_v55 }
 0x347   : > { %v1098_v57 = vpop.f32.mrf.mxu0 }
 0x348   : > { %v1099_v58 = vadd.f32 %v2082_v4, %v1098_v57 }
 0x349   : > { %v1494_v59 = vpop.f32.mrf.mxu0 }
 0x34a   : > { %1361 = vst.msk [vmem:[%s2087_s6 + $0x128] sm:$0xff] %vm601_vm1, %v1099_v58 }
 0x34b   : > { %v1101_v60 = vpop.f32.mrf.mxu0 }
 0x34c   : > { %v1102_v61 = vadd.f32 %v2082_v4, %v1101_v60 }
 0x34d   : > { %v1495_v62 = vpop.f32.mrf.mxu0 }
 0x34e   : > { %1362 = vst.msk [vmem:[%s2087_s6 + $0x130] sm:$0xff] %vm601_vm1, %v1102_v61 }
 0x34f   : > { %v1106_v63 = vpop.f32.mrf.mxu0 }
 0x350   : > { %v1107_v1 = vadd.f32 %v2082_v4, %v1106_v63 }
 0x351   : > { %v1498_v2 = vpop.f32.mrf.mxu0 }
 0x352   : > { %1363 = vst.msk [vmem:[%s2087_s6 + $0x138] sm:$0xff] %vm601_vm1, %v1107_v1 }
 0x353   : > { %v1109_v6 = vpop.f32.mrf.mxu0 }
 0x354   : > { %v1110_v7 = vadd.f32 %v2082_v4, %v1109_v6 }
 0x355   : > { %v1499_v9 = vpop.f32.mrf.mxu0 }
 0x356   : > { %1364 = vst.msk [vmem:[%s2087_s6 + $0x140] sm:$0xff] %vm601_vm1, %v1110_v7 }
 0x357   : > { %v1114_v10 = vpop.f32.mrf.mxu0 }
 0x358   : > { %v1115_v11 = vadd.f32 %v2082_v4, %v1114_v10 }
 0x359   : > { %v1502_v12 = vpop.f32.mrf.mxu0 }
 0x35a   : > { %1365 = vst.msk [vmem:[%s2087_s6 + $0x148] sm:$0xff] %vm601_vm1, %v1115_v11 }
 0x35b   : > { %v1117_v13 = vpop.f32.mrf.mxu0 }
 0x35c   : > { %v1118_v14 = vadd.f32 %v2082_v4, %v1117_v13 }
 0x35d   : > { %v1503_v15 = vpop.f32.mrf.mxu0 }
 0x35e   : > { %1366 = vst.msk [vmem:[%s2087_s6 + $0x150] sm:$0xff] %vm601_vm1, %v1118_v14 }
 0x35f   : > { %v1122_v16 = vpop.f32.mrf.mxu0 }
 0x360   : > { %v1123_v17 = vadd.f32 %v2082_v4, %v1122_v16 }
 0x361   : > { %v1506_v18 = vpop.f32.mrf.mxu0 }
 0x362   : > { %1367 = vst.msk [vmem:[%s2087_s6 + $0x158] sm:$0xff] %vm601_vm1, %v1123_v17 }
 0x363   : > { %v1125_v19 = vpop.f32.mrf.mxu0 }
 0x364   : > { %v1126_v20 = vadd.f32 %v2082_v4, %v1125_v19 }
 0x365   : > { %v1507_v21 = vpop.f32.mrf.mxu0 }
 0x366   : > { %1368 = vst.msk [vmem:[%s2087_s6 + $0x160] sm:$0xff] %vm601_vm1, %v1126_v20 }
 0x367   : > { %v1130_v22 = vpop.f32.mrf.mxu0 }
 0x368   : > { %v1131_v23 = vadd.f32 %v2082_v4, %v1130_v22 }
 0x369   : > { %v1510_v24 = vpop.f32.mrf.mxu0 }
 0x36a   : > { %1369 = vst.msk [vmem:[%s2087_s6 + $0x168] sm:$0xff] %vm601_vm1, %v1131_v23 }
 0x36b   : > { %v1133_v26 = vpop.f32.mrf.mxu0 }
 0x36c   : > { %v1134_v27 = vadd.f32 %v2082_v4, %v1133_v26 }
 0x36d   : > { %v1511_v29 = vpop.f32.mrf.mxu0 }
 0x36e   : > { %1370 = vst.msk [vmem:[%s2087_s6 + $0x170] sm:$0xff] %vm601_vm1, %v1134_v27 }
 0x36f   : > { %v1138_v30 = vpop.f32.mrf.mxu0 }
 0x370   : > { %v1139_v32 = vadd.f32 %v2082_v4, %v1138_v30 }
 0x371   : > { %v1514_v33 = vpop.f32.mrf.mxu0 }
 0x372   : > { %1371 = vst.msk [vmem:[%s2087_s6 + $0x178] sm:$0xff] %vm601_vm1, %v1139_v32 }
 0x373   : > { %v1141_v0 = vpop.f32.mrf.mxu0 }
 0x374   : > { %v1142_v34 = vadd.f32 %v2082_v4, %v1141_v0 }
 0x375   : > { %v1515_v3 = vpop.f32.mrf.mxu0 }
 0x376   : > { %1372 = vst.msk [vmem:[%s2087_s6 + $0x180] sm:$0xff] %vm601_vm1, %v1142_v34 }
 0x377   : > { %v1146_v5 = vpop.f32.mrf.mxu0 }
 0x378   : > { %v1147_v8 = vadd.f32 %v2082_v4, %v1146_v5 }
 0x379   : > { %v1518_v25 = vpop.f32.mrf.mxu0 }
 0x37a   : > { %1373 = vst.msk [vmem:[%s2087_s6 + $0x188] sm:$0xf] %vm801_vm2, %v1147_v8 }
 0x37b   : > { %v1149_v28 = vpop.f32.mrf.mxu0 }
 0x37d   : > { %v1519_v31 = vpop.f32.mrf.mxu0 }
 0x37e PF: > { %s2309_s18 = smov %s1870_s15  ;;  %p15_p7 = scmp.ge.s32.totalorder %s1861_s12, 4  }
 0x37f   : > { %s2310_s15 = smov %s1749_s16  ;;  %s2311_s16 = smov %s1753_s17 }
 0x380   : > { %s2312_s17 = smov %s2309_s18  ;;  %s2313_s18 = smov %s1861_s12 }
 0x381   :  { %17 = sbr.rel (!%p15_p7) target bundleno = 4 (0x4), region = 86 }
 0x386   :  { %1202 = vsyncpa [#allocation3], 1 }
 0x387   :  { %1204 = vsyncpa [#allocation3 + $0x1], 1 }
 0x388   :  { %1205 = vsyncpa [#allocation5], 1 }

</bundles_post_ra>
